<compile_context>
chip_gen: v6e
topology: v6e:2x2x1
jax: 0.10.0
libtpu: 0.0.40
codegen_flags: <defaults>
</compile_context>

<pallas_src>
import jax
import jax.numpy as jnp
import numpy as np
from jax.experimental import pallas as pl
from jax.experimental.pallas import tpu as pltpu


def _reg_l1_kernel(ind_ref, feat_ref, tgt_ref, mask_ref, out_ref, pred_acc):
    # ind_ref : (1, 1, K) int32 block   (gather indices for batch b)
    # feat_ref: (1, C, T) block         (contiguous spatial slab, native dtype)
    # tgt_ref : (1, C, K) block         (regression targets, native dtype)
    # mask_ref: (1, 1, K) float32 block
    # out_ref : (1, 1, 128) float32     (lane 0: numerator, lane 1: denominator)
    # pred_acc: (C, K) float32 VMEM scratch (gathered prediction accumulator)
    t = pl.program_id(1)
    n_t = pl.num_programs(1)
    C, K = pred_acc.shape
    T = feat_ref.shape[-1]

    @pl.when(t == 0)
    def _():
        pred_acc[...] = jnp.zeros_like(pred_acc)

    # One-hot gather-accumulate on the MXU: pred += feat @ onehot.
    hw_ids = t * T + jax.lax.broadcasted_iota(jnp.int32, (T, K), 0)   # (T, K)
    onehot = (hw_ids == ind_ref[0]).astype(jnp.float32)               # (T, K)
    pred_acc[...] += jnp.dot(feat_ref[0].astype(jnp.float32), onehot,
                             preferred_element_type=jnp.float32)      # (C, K)

    @pl.when(t == n_t - 1)
    def _():
        tgt = tgt_ref[0].astype(jnp.float32)          # (C, K)
        m = mask_ref[0]                               # (1, K) float32
        # |pred*m - tgt*m| == |pred - tgt| * m since m is {0,1} (non-negative).
        v = jnp.abs(pred_acc[...] - tgt) * m          # (C, K)
        num = jnp.sum(v)
        den = jnp.sum(m) * jnp.float32(C)
        lane = jax.lax.broadcasted_iota(jnp.int32, (1, 1, 128), 2)
        out_ref[...] = jnp.where(lane == 0, num,
                                 jnp.where(lane == 1, den, jnp.float32(0.0)))


def _pick_spatial_tile(hw, cap):
    """Largest multiple-of-128 divisor of hw that is <= cap, else hw itself."""
    if hw <= cap or hw % 128 != 0:
        return hw
    best = hw
    t = 128
    while t <= cap:
        if hw % t == 0:
            best = t
        t += 128
    return best


def reg_l1_loss(output, mask, ind, target, *, spatial_tile_cap=512):
    """output: (B, C, H, W) NCHW; mask: (B, K); ind: (B, K) int; target: (B, K, C)."""
    B, C, H, W = output.shape
    K = ind.shape[1]
    HW = H * W

    # Free reshape: the feature map stays in its native NCHW layout in HBM.
    feat = output.reshape(B, C, HW)
    # Tiny (B*K*C)-sized rearrangements to present lane-dense blocks.
    tgt = jnp.transpose(target, (0, 2, 1))                    # (B, C, K)
    mask_f = mask.astype(jnp.float32).reshape(B, 1, K)        # (B, 1, K)
    ind3 = ind.astype(jnp.int32).reshape(B, 1, K)             # (B, 1, K)

    T = _pick_spatial_tile(HW, spatial_tile_cap)
    n_t = HW // T

    partials = pl.pallas_call(
        _reg_l1_kernel,
        out_shape=jax.ShapeDtypeStruct((B, 1, 128), jnp.float32),
        grid_spec=pltpu.PrefetchScalarGridSpec(
            num_scalar_prefetch=0,
            grid=(B, n_t),
            in_specs=[
                pl.BlockSpec((1, 1, K), lambda b, t: (b, 0, 0)),   # ind
                pl.BlockSpec((1, C, T), lambda b, t: (b, 0, t)),   # feat slab
                pl.BlockSpec((1, C, K), lambda b, t: (b, 0, 0)),   # target
                pl.BlockSpec((1, 1, K), lambda b, t: (b, 0, 0)),   # mask
            ],
            out_specs=pl.BlockSpec((1, 1, 128), lambda b, t: (b, 0, 0)),
            scratch_shapes=[pltpu.VMEM((C, K), jnp.float32)],
        ),
        compiler_params=pltpu.CompilerParams(
            dimension_semantics=("parallel", "arbitrary")),
    )(ind3, feat, tgt, mask_f)

    num = jnp.sum(partials[:, 0, 0])
    den = jnp.sum(partials[:, 0, 1])
    return num / (den + jnp.float32(1e-4))


def reg_l1_loss_ref(output, mask, ind, target):
    """Pure-JAX reference matching the PyTorch module exactly."""
    B, C, H, W = output.shape
    K = ind.shape[1]
    feat = jnp.transpose(output, (0, 2, 3, 1)).reshape(B, H * W, C)
    gather_idx = jnp.broadcast_to(ind[:, :, None].astype(jnp.int32), (B, K, C))
    pred = jnp.take_along_axis(feat, gather_idx, axis=1)
    m = jnp.broadcast_to(mask[:, :, None].astype(jnp.float32), (B, K, C))
    num = jnp.sum(jnp.abs(pred * m - target.astype(jnp.float32) * m))
    return num / (jnp.sum(m) + 1e-4)


if __name__ == "__main__":
    B, C, H, W, K = 2, 4, 16, 16, 8
    key = jax.random.PRNGKey(0)
    k1, k2, k3, k4 = jax.random.split(key, 4)

    output = jax.random.normal(k1, (B, C, H, W), dtype=jnp.float32)
    target = jax.random.normal(k2, (B, K, C), dtype=jnp.float32)
    ind = jax.random.randint(k3, (B, K), 0, H * W, dtype=jnp.int32)
    mask = jax.random.bernoulli(k4, 0.7, (B, K)).astype(jnp.float32)

    loss = jax.jit(reg_l1_loss)(output, mask, ind, target)
    loss = jax.block_until_ready(loss)

    loss_ref = jax.block_until_ready(reg_l1_loss_ref(output, mask, ind, target))
    np.testing.assert_allclose(np.asarray(loss), np.asarray(loss_ref),
                               rtol=1e-5, atol=1e-5)
    print("KERNEL_OK")
</pallas_src>

<mosaic_0001>
module attributes {stable_mosaic.version = 11 : i64} {
  func.func @_reg_l1_kernel(%arg0: i32, %arg1: i32, %arg2: memref<1x1x8xi32, #tpu.memory_space<vmem>>, %arg3: memref<1x4x256xf32, #tpu.memory_space<vmem>>, %arg4: memref<1x4x8xf32, #tpu.memory_space<vmem>>, %arg5: memref<1x1x8xf32, #tpu.memory_space<vmem>>, %arg6: memref<1x1x128xf32, #tpu.memory_space<vmem>>, %arg7: memref<4x8xf32, #tpu.memory_space<vmem>>) attributes {dimension_semantics = [#tpu.dimension_semantics<parallel>, #tpu.dimension_semantics<arbitrary>], iteration_bounds = array<i64: 2, 1>, scalar_prefetch = 0 : i64, scratch_operands = 1 : i64, tpu.core_type = #tpu.core_type<tc>, window_params = [{transform_indices = @transform_0, window_bounds = array<i64: 1, 1, 8>}, {transform_indices = @transform_1, window_bounds = array<i64: 1, 4, 256>}, {transform_indices = @transform_2, window_bounds = array<i64: 1, 4, 8>}, {transform_indices = @transform_3, window_bounds = array<i64: 1, 1, 8>}, {transform_indices = @transform_4, window_bounds = array<i64: 1, 1, 128>}]} {
    %c0_i32 = arith.constant 0 : i32
    %0 = arith.cmpi eq, %arg1, %c0_i32 : i32
    %1 = arith.extui %0 : i1 to i32
    %c0_i32_0 = arith.constant 0 : i32
    %2 = arith.cmpi ne, %1, %c0_i32_0 : i32
    scf.if %2 {
      %cst_12 = arith.constant 0.000000e+00 : f32
      %22 = vector.broadcast %cst_12 : f32 to vector<4x8xf32>
      %c0_13 = arith.constant 0 : index
      %c0_14 = arith.constant 0 : index
      %23 = vector.load %arg7[%c0_13, %c0_14] : memref<4x8xf32, #tpu.memory_space<vmem>>, vector<4x8xf32>
      tpu.vector_store %arg7[%c0_13, %c0_14], %22 {strides = array<i32>} : memref<4x8xf32, #tpu.memory_space<vmem>>, vector<4x8xf32>,
    } else {
    }
    %c256_i32 = arith.constant 256 : i32
    %3 = arith.muli %arg1, %c256_i32 : i32
    %4 = tpu.iota {dimensions = array<i32: 0>} : vector<256x8xi32>
    %5 = vector.broadcast %3 : i32 to vector<256x8xi32>
    %6 = arith.addi %5, %4 : vector<256x8xi32>
    %c0 = arith.constant 0 : index
    %c0_1 = arith.constant 0 : index
    %c0_2 = arith.constant 0 : index
    %7 = vector.load %arg2[%c0, %c0_1, %c0_2] : memref<1x1x8xi32, #tpu.memory_space<vmem>>, vector<1x1x8xi32>
    %8 = vector.shape_cast %7 : vector<1x1x8xi32> to vector<1x8xi32>
    %9 = vector.broadcast %8 : vector<1x8xi32> to vector<256x8xi32>
    %10 = arith.cmpi eq, %6, %9 : vector<256x8xi32>
    %11 = arith.extui %10 : vector<256x8xi1> to vector<256x8xi32>
    %12 = arith.sitofp %11 : vector<256x8xi32> to vector<256x8xf32>
    %c0_3 = arith.constant 0 : index
    %c0_4 = arith.constant 0 : index
    %13 = vector.load %arg7[%c0_3, %c0_4] : memref<4x8xf32, #tpu.memory_space<vmem>>, vector<4x8xf32>
    %c0_5 = arith.constant 0 : index
    %c0_6 = arith.constant 0 : index
    %c0_7 = arith.constant 0 : index
    %14 = vector.load %arg3[%c0_5, %c0_6, %c0_7] : memref<1x4x256xf32, #tpu.memory_space<vmem>>, vector<1x4x256xf32>
    %15 = vector.shape_cast %14 : vector<1x4x256xf32> to vector<4x256xf32>
    %cst = arith.constant dense<0.000000e+00> : vector<4x8xf32>
    %16 = tpu.matmul %15, %12, %cst {dimension_numbers = #tpu.dot_dimension_numbers<[1], [0], [0], [1], [0, 0, 1, 1], [], []>} : vector<4x256xf32>, vector<256x8xf32>, vector<4x8xf32> -> vector<4x8xf32>
    %17 = arith.addf %13, %16 : vector<4x8xf32>
    %c0_8 = arith.constant 0 : index
    %c0_9 = arith.constant 0 : index
    %18 = vector.load %arg7[%c0_8, %c0_9] : memref<4x8xf32, #tpu.memory_space<vmem>>, vector<4x8xf32>
    tpu.vector_store %arg7[%c0_8, %c0_9], %17 {strides = array<i32>} : memref<4x8xf32, #tpu.memory_space<vmem>>, vector<4x8xf32>,
    %c0_i32_10 = arith.constant 0 : i32
    %19 = arith.cmpi eq, %arg1, %c0_i32_10 : i32
    %20 = arith.extui %19 : i1 to i32
    %c0_i32_11 = arith.constant 0 : i32
    %21 = arith.cmpi ne, %20, %c0_i32_11 : i32
    scf.if %21 {
      %c0_12 = arith.constant 0 : index
      %c0_13 = arith.constant 0 : index
      %c0_14 = arith.constant 0 : index
      %22 = vector.load %arg4[%c0_12, %c0_13, %c0_14] : memref<1x4x8xf32, #tpu.memory_space<vmem>>, vector<1x4x8xf32>
      %23 = vector.shape_cast %22 : vector<1x4x8xf32> to vector<4x8xf32>
      %c0_15 = arith.constant 0 : index
      %c0_16 = arith.constant 0 : index
      %c0_17 = arith.constant 0 : index
      %24 = vector.load %arg5[%c0_15, %c0_16, %c0_17] : memref<1x1x8xf32, #tpu.memory_space<vmem>>, vector<1x1x8xf32>
      %25 = vector.shape_cast %24 : vector<1x1x8xf32> to vector<1x8xf32>
      %c0_18 = arith.constant 0 : index
      %c0_19 = arith.constant 0 : index
      %26 = vector.load %arg7[%c0_18, %c0_19] : memref<4x8xf32, #tpu.memory_space<vmem>>, vector<4x8xf32>
      %27 = arith.subf %26, %23 : vector<4x8xf32>
      %28 = math.absf %27 : vector<4x8xf32>
      %29 = vector.broadcast %25 : vector<1x8xf32> to vector<4x8xf32>
      %30 = arith.mulf %28, %29 : vector<4x8xf32>
      %31 = vector.shape_cast %30 : vector<4x8xf32> to vector<1x4x8xf32>
      %cst_20 = arith.constant dense<0.000000e+00> : vector<1xf32>
      %32 = vector.multi_reduction <add>, %31, %cst_20 [1, 2] : vector<1x4x8xf32> to vector<1xf32>
      %33 = vector.shape_cast %32 : vector<1xf32> to vector<1x1x1xf32>
      %34 = vector.extract %33[0, 0, 0] : f32 from vector<1x1x1xf32>
      %35 = vector.shape_cast %25 : vector<1x8xf32> to vector<1x1x8xf32>
      %cst_21 = arith.constant dense<0.000000e+00> : vector<1xf32>
      %36 = vector.multi_reduction <add>, %35, %cst_21 [1, 2] : vector<1x1x8xf32> to vector<1xf32>
      %37 = vector.shape_cast %36 : vector<1xf32> to vector<1x1x1xf32>
      %38 = vector.extract %37[0, 0, 0] : f32 from vector<1x1x1xf32>
      %cst_22 = arith.constant 4.000000e+00 : f32
      %39 = arith.mulf %38, %cst_22 : f32
      %40 = tpu.iota {dimensions = array<i32: 2>} : vector<1x1x128xi32>
      %c0_i32_23 = arith.constant 0 : i32
      %41 = vector.broadcast %c0_i32_23 : i32 to vector<1x1x128xi32>
      %42 = arith.cmpi eq, %40, %41 : vector<1x1x128xi32>
      %c1_i32 = arith.constant 1 : i32
      %43 = vector.broadcast %c1_i32 : i32 to vector<1x1x128xi32>
      %44 = arith.cmpi eq, %40, %43 : vector<1x1x128xi32>
      %cst_24 = arith.constant 0.000000e+00 : f32
      %45 = vector.broadcast %39 : f32 to vector<1x1x128xf32>
      %46 = vector.broadcast %cst_24 : f32 to vector<1x1x128xf32>
      %47 = arith.select %44, %45, %46 : vector<1x1x128xi1>, vector<1x1x128xf32>
      %48 = vector.broadcast %34 : f32 to vector<1x1x128xf32>
      %49 = arith.select %42, %48, %47 : vector<1x1x128xi1>, vector<1x1x128xf32>
      %c0_25 = arith.constant 0 : index
      %c0_26 = arith.constant 0 : index
      %c0_27 = arith.constant 0 : index
      %50 = vector.load %arg6[%c0_25, %c0_26, %c0_27] : memref<1x1x128xf32, #tpu.memory_space<vmem>>, vector<1x1x128xf32>
      tpu.vector_store %arg6[%c0_25, %c0_26, %c0_27], %49 {strides = array<i32>} : memref<1x1x128xf32, #tpu.memory_space<vmem>>, vector<1x1x128xf32>,
    } else {
    }
    return
  }
  func.func @transform_0(%arg0: i32, %arg1: i32) -> (i32, i32, i32) {
    %c0_i32 = arith.constant 0 : i32
    %c0_i32_0 = arith.constant 0 : i32
    %c0_i32_1 = arith.constant 0 : i32
    return %arg0, %c0_i32, %c0_i32_0 : i32, i32, i32
  }
  func.func @transform_1(%arg0: i32, %arg1: i32) -> (i32, i32, i32) {
    %c0_i32 = arith.constant 0 : i32
    %c0_i32_0 = arith.constant 0 : i32
    return %arg0, %c0_i32, %arg1 : i32, i32, i32
  }
  func.func @transform_2(%arg0: i32, %arg1: i32) -> (i32, i32, i32) {
    %c0_i32 = arith.constant 0 : i32
    %c0_i32_0 = arith.constant 0 : i32
    %c0_i32_1 = arith.constant 0 : i32
    return %arg0, %c0_i32, %c0_i32_0 : i32, i32, i32
  }
  func.func @transform_3(%arg0: i32, %arg1: i32) -> (i32, i32, i32) {
    %c0_i32 = arith.constant 0 : i32
    %c0_i32_0 = arith.constant 0 : i32
    %c0_i32_1 = arith.constant 0 : i32
    return %arg0, %c0_i32, %c0_i32_0 : i32, i32, i32
  }
  func.func @transform_4(%arg0: i32, %arg1: i32) -> (i32, i32, i32) {
    %c0_i32 = arith.constant 0 : i32
    %c0_i32_0 = arith.constant 0 : i32
    %c0_i32_1 = arith.constant 0 : i32
    return %arg0, %c0_i32, %c0_i32_0 : i32, i32, i32
  }
}

</mosaic_0001>

<bundles_post_ra>
// kernel: reg_l1_loss.1
= control target key start
LH: loop header
LB: loop body
LE: loop exit
PB: predicated region body
PF: predicated region fallthrough
CT: control target
= control target key end

     0   :  { %s849_s15 = smov 0   ;;  %s851_s16 = smov 0   ;;  %s1004_s0 = inlined_call_operand.vmem [shape: s32[2,1,8], index: 0, kind: input, shape index: {}]   ;;  %s1005_s1 = inlined_call_operand.vmem [shape: f32[2,4,256], index: 1, kind: input, shape index: {}]   ;;  %s1006_s2 = inlined_call_operand.vmem [shape: f32[2,4,8], index: 2, kind: input, shape index: {}]   ;;  %s1007_s3 = inlined_call_operand.vmem [shape: f32[2,1,8], index: 3, kind: input, shape index: {}]   ;;  %s1008_s4 = inlined_call_operand.vmem [shape: f32[2,1,128], index: 4, kind: output, shape index: {}]  }
   0x1   :  { %s853_s17 = smov 0  }
   0x2 LB: > { %s26_s18 = sadd.s32 1, %s816_s16  ;;  %p660_p0 = scmp.ge.s32.totalorder %s820_s17, 1  ;;  %s820_s17 = sphi %s853_s17, %s14_s17   ;;  %s816_s16 = sphi %s851_s16, %s1010_s16   ;;  %s812_s15 = sphi %s849_s15, %s1009_s15  }
   0x3   : > { %p28_p1 = scmp.ge.s32.totalorder %s26_s18, 2  ;;  %p206_p2 = scmp.lt.s32.totalorder %s820_s17, 3 }
   0x5   : > { %s1012_s18 = smov (%p28_p1, %s26_s18), 0  ;;  %p207_p3 = pnand %p660_p0, %p206_p2 }
   0x6   : > { %p244_p4 = scmp.lt.s32.totalorder (!%p207_p3), %s812_s15, 1 }
   0x7   : > { %210 = sbr.rel (%p207_p3) target bundleno = 475 (0x1db), region = 36 }
   0xc   : > { %v274_v0 = vlaneseq  ;;  %s1014_s15 = smov (!%p244_p4, %s812_s15), 1  ;;  %v822_v10 = vmov 1.0   ;;  %v823_v37 = vmov 0.0  }
   0xd   : > { %s246_s21 = scalar_lea.vmem %s1004_s0, %s1014_s15  ;;  %s731_s22 = sshll.u32 %s1014_s15, 3 }
   0xe   : > { %v870_v1 = vshrl.u32 %v274_v0, 7  ;;  %v880_v6 = vld [vmem:[%s246_s21] ss:$0 sm:$0xff]  ;;  %s255_s25 = scalar_lea.vmem %s1005_s1, %s731_s22  ;;  %s663_s26 = sshll.u32 %s1014_s15, 2 }
   0xf   : > { %v442_v21 = vld [vmem:[%s255_s25] sm:$0xff]  ;;  %s260_s29 = scalar_lea.vmem %s1006_s2, %s663_s26  ;;  %s263_s6 = scalar_lea.vmem %s1007_s3, %s1014_s15 }
  0x10   : > { %v306_v2 = vadd.s32 248, %v870_v1  ;;  %v290_v3 = vadd.s32 120, %v870_v1  ;;  %v305_v4 = vadd.s32 240, %v870_v1  ;;  %v289_v5 = vadd.s32 112, %v870_v1  ;;  %v522_v44 = vld [vmem:[%s260_s29] sm:$0xf]  ;;  %s266_s12 = scalar_lea.vmem %s1008_s4, %s1014_s15 }
  0x11   : > { %v304_v7 = vadd.s32 232, %v870_v1  ;;  %v288_v8 = vadd.s32 104, %v870_v1  ;;  %v303_v9 = vadd.s32 224, %v870_v1  ;;  %v287_v11 = vadd.s32 96, %v870_v1  ;;  %v523_v45 = vld [vmem:[%s263_s6] sm:$0x1] }
  0x12   : > { %vm376_vm0 = vcmp.eq.s32.totalorder %v306_v2, %v880_v6  ;;  %vm360_vm1 = vcmp.eq.s32.totalorder %v290_v3, %v880_v6  ;;  %vm375_vm2 = vcmp.eq.s32.totalorder %v305_v4, %v880_v6  ;;  %vm359_vm3 = vcmp.eq.s32.totalorder %v289_v5, %v880_v6 }
  0x13   : > { %732 = vmatprep.subr.msk.mxu0 %vm376_vm0, %v822_v10  ;;  %vm374_vm4 = vcmp.eq.s32.totalorder %v304_v7, %v880_v6  ;;  %v302_v12 = vadd.s32 216, %v870_v1  ;;  %vm358_vm5 = vcmp.eq.s32.totalorder %v288_v8, %v880_v6  ;;  %v286_v13 = vadd.s32 88, %v870_v1 }
  0x14   : > { %733 = vmatpush3.msk.msra.mxu0 %vm360_vm1, %v822_v10  ;;  %vm373_vm6 = vcmp.eq.s32.totalorder %v303_v9, %v880_v6  ;;  %v301_v14 = vadd.s32 208, %v870_v1  ;;  %vm357_vm7 = vcmp.eq.s32.totalorder %v287_v11, %v880_v6  ;;  %v285_v15 = vadd.s32 80, %v870_v1 }
  0x15   : > { %734 = vmatprep.subr.msk.mxu0 %vm375_vm2, %v822_v10  ;;  %vm372_vm8 = vcmp.eq.s32.totalorder %v302_v12, %v880_v6  ;;  %v300_v16 = vadd.s32 200, %v870_v1  ;;  %vm356_vm9 = vcmp.eq.s32.totalorder %v286_v13, %v880_v6  ;;  %v284_v17 = vadd.s32 72, %v870_v1 }
  0x16   : > { %735 = vmatpush3.msk.msra.mxu0 %vm359_vm3, %v822_v10  ;;  %vm371_vm10 = vcmp.eq.s32.totalorder %v301_v14, %v880_v6  ;;  %v299_v18 = vadd.s32 192, %v870_v1  ;;  %vm355_vm11 = vcmp.eq.s32.totalorder %v285_v15, %v880_v6  ;;  %v283_v19 = vadd.s32 64, %v870_v1 }
  0x17   : > { %736 = vmatprep.subr.msk.mxu0 %vm374_vm4, %v822_v10  ;;  %vm370_vm12 = vcmp.eq.s32.totalorder %v300_v16, %v880_v6  ;;  %v298_v20 = vadd.s32 184, %v870_v1  ;;  %vm354_vm13 = vcmp.eq.s32.totalorder %v284_v17, %v880_v6  ;;  %v282_v22 = vadd.s32 56, %v870_v1 }
  0x18   : > { %737 = vmatpush3.msk.msra.mxu0 %vm358_vm5, %v822_v10  ;;  %vm369_vm14 = vcmp.eq.s32.totalorder %v299_v18, %v880_v6  ;;  %v297_v23 = vadd.s32 176, %v870_v1  ;;  %vm353_vm15 = vcmp.eq.s32.totalorder %v283_v19, %v880_v6  ;;  %v281_v24 = vadd.s32 48, %v870_v1 }
  0x19   : > { %738 = vmatprep.subr.msk.mxu0 %vm373_vm6, %v822_v10  ;;  %v444_v25 = vcombine.high %v442_v21, %v442_v21  ;;  %vm368_vm0 = vcmp.eq.s32.totalorder %v298_v20, %v880_v6  ;;  %v296_v26 = vadd.s32 168, %v870_v1  ;;  %vm352_vm1 = vcmp.eq.s32.totalorder %v282_v22, %v880_v6 }
  0x1a   : > { %739 = vmatpush3.msk.msra.mxu0 %vm357_vm7, %v822_v10  ;;  %v280_v27 = vadd.s32 40, %v870_v1  ;;  %vm367_vm2 = vcmp.eq.s32.totalorder %v297_v23, %v880_v6  ;;  %v295_v28 = vadd.s32 160, %v870_v1  ;;  %vm351_vm3 = vcmp.eq.s32.totalorder %v281_v24, %v880_v6 }
  0x1b   : > { %740 = vmatprep.subr.msk.mxu0 %vm372_vm8, %v822_v10  ;;  %510 = vmatprep.mubr.f32.mxu0 %v444_v25  ;;  %v279_v29 = vadd.s32 32, %v870_v1  ;;  %vm366_vm4 = vcmp.eq.s32.totalorder %v296_v26, %v880_v6  ;;  %v294_v30 = vadd.s32 152, %v870_v1  ;;  %v278_v31 = vadd.s32 24, %v870_v1 }
  0x1c   : > { %741 = vmatpush3.msk.msra.mxu0 %vm356_vm9, %v822_v10  ;;  %vm350_vm5 = vcmp.eq.s32.totalorder %v280_v27, %v880_v6  ;;  %vm365_vm6 = vcmp.eq.s32.totalorder %v295_v28, %v880_v6  ;;  %v293_v32 = vadd.s32 144, %v870_v1  ;;  %v277_v33 = vadd.s32 16, %v870_v1 }
  0x1d   : > { %742 = vmatprep.subr.msk.mxu0 %vm371_vm10, %v822_v10  ;;  %vm349_vm7 = vcmp.eq.s32.totalorder %v279_v29, %v880_v6  ;;  %vm364_vm8 = vcmp.eq.s32.totalorder %v294_v30, %v880_v6  ;;  %v292_v34 = vadd.s32 136, %v870_v1  ;;  %vm348_vm9 = vcmp.eq.s32.totalorder %v278_v31, %v880_v6 }
  0x1e   : > { %743 = vmatpush3.msk.msra.mxu0 %vm355_vm11, %v822_v10  ;;  %v276_v35 = vadd.s32 8, %v870_v1  ;;  %vm363_vm10 = vcmp.eq.s32.totalorder %v293_v32, %v880_v6  ;;  %v291_v36 = vadd.s32 128, %v870_v1  ;;  %vm347_vm11 = vcmp.eq.s32.totalorder %v277_v33, %v880_v6 }
  0x1f   : > { %744 = vmatprep.subr.msk.mxu0 %vm370_vm12, %v822_v10  ;;  %vm362_vm12 = vcmp.eq.s32.totalorder %v292_v34, %v880_v6  ;;  %v530_v43 = vsub.s32 0, %v870_v1  ;;  %v557_v4 = vand.u32 127, %v274_v0 }
  0x20   : > { %745 = vmatpush3.msk.msra.mxu0 %vm354_vm13, %v822_v10  ;;  %vm346_vm13 = vcmp.eq.s32.totalorder %v276_v35, %v880_v6 }
  0x21   : > { %746 = vmatprep.subr.msk.mxu0 %vm369_vm14, %v822_v10  ;;  %vm361_vm14 = vcmp.eq.s32.totalorder %v291_v36, %v880_v6  ;;  %v531_v48 = vrot.slane %v523_v45, %v530_v43 }
  0x22   : > { %747 = vmatpush3.msk.msra.mxu0 %vm353_vm15, %v822_v10  ;;  %vm345_vm15 = vcmp.eq.s32.totalorder %v870_v1, %v880_v6 }
  0x23   : > { %748 = vmatprep.subr.msk.mxu0 %vm368_vm0, %v822_v10  ;;  %vm271_vm0 = vcmask 60416  }
  0x24   : > { %749 = vmatpush3.msk.msra.mxu0 %vm352_vm1, %v822_v10  ;;  %272 = vst.msk [vmem:[#allocation2] sm:$0xf] %vm271_vm0, %v823_v37  ;;  %vm544_vm1 = vcmask 57344  }
  0x25   : > { %750 = vmatprep.subr.msk.mxu0 %vm367_vm2, %v822_v10  ;;  %v545_v52 = vsel %vm544_vm1, %v523_v45, 0.0  ;;  %vm559_vm2 = vcmp.eq.s32.totalorder %v557_v4, 1 }
  0x26   : > { %751 = vmatpush3.msk.msra.mxu0 %vm351_vm3, %v822_v10  ;;  %vm558_vm3 = vcmp.eq.s32.totalorder %v557_v4, 0 }
  0x27   : > { %752 = vmatprep.subr.msk.mxu0 %vm366_vm4, %v822_v10 }
  0x28   : > { %753 = vmatpush3.msk.msra.mxu0 %vm350_vm5, %v822_v10 }
  0x29   : > { %754 = vmatprep.subr.msk.mxu0 %vm365_vm6, %v822_v10 }
  0x2a   : > { %755 = vmatpush3.msk.msra.mxu0 %vm349_vm7, %v822_v10 }
  0x2b   : > { %756 = vmatprep.subr.msk.mxu0 %vm364_vm8, %v822_v10  ;;  %v441_v40 = vld [vmem:[#allocation2] sm:$0xf] }
  0x2c   : > { %757 = vmatpush3.msk.msra.mxu0 %vm348_vm9, %v822_v10 }
  0x2d   : > { %758 = vmatprep.subr.msk.mxu0 %vm363_vm10, %v822_v10 }
  0x2e   : > { %759 = vmatpush3.msk.msra.mxu0 %vm347_vm11, %v822_v10 }
  0x2f   : > { %760 = vmatprep.subr.msk.mxu0 %vm362_vm12, %v822_v10 }
  0x30   : > { %761 = vmatpush3.msk.msra.mxu0 %vm346_vm13, %v822_v10 }
  0x31   : > { %762 = vmatprep.subr.msk.mxu0 %vm361_vm14, %v822_v10 }
  0x32   : > { %763 = vmatpush3.msk.msra.mxu0 %vm345_vm15, %v822_v10 }
  0x33   : > { %511 = vmatmul.mubr.f32.vlgmr.msra.gmra.mxu0 %v442_v21 }
  0xf3   : > { %v764_v38 = vpop.f32.mrf.mxu0 }
  0xf5   : > { %v765_v39 = vpop.f32.mrf.mxu0 }
  0xf6   : > { %v766_v41 = vadd.f32 %v765_v39, %v764_v38 }
  0xf8   : > { %v516_v42 = vadd.f32 %v766_v41, %v441_v40 }
  0xfa   : > { %518 = vst.msk [vmem:[#allocation2] sm:$0xf] %vm271_vm0, %v516_v42 }
 0x101   : > { %v524_v46 = vld [vmem:[#allocation2] sm:$0xf] }
 0x102   : > { %v525_v47 = vsub.f32 %v524_v46, %v522_v44 }
 0x104   : > { %v526_v49 = vand.u32 2147483647, %v525_v47 }
 0x106   : > { %v533_v50 = vmul.f32 %v531_v48, %v526_v49 }
 0x108   : > { %v534_v51 = vsel %vm271_vm0, %v533_v50, 0.0 }
 0x109   : > { %535 = vadd.xlane.f32.xlu0 %v534_v51 }
 0x10d   : > { %546 = vadd.xlane.f32.xlu0 %v545_v52 }
 0x192   : > { %v536_v53 = vpop.xlane.xlu0 %535 }
 0x193   : > { %v537_v54 = vrot.slane %v536_v53, 4 }
 0x195   : > { %v538_v55 = vadd.f32 %v537_v54, %v536_v53 }
 0x196   : > { %v547_v56 = vpop.xlane.xlu0 %546 }
 0x197   : > { %v539_v57 = vrot.slane %v538_v55, 2  ;;  %v548_v58 = vrot.slane %v547_v56, 4 }
 0x199   : > { %v549_v59 = vadd.f32 %v548_v58, %v547_v56  ;;  %v540_v60 = vadd.f32 %v539_v57, %v538_v55 }
 0x19b   : > { %v550_v61 = vrot.slane %v549_v59, 2  ;;  %v541_v62 = vrot.slane %v540_v60, 1 }
 0x19d   : > { %v551_v63 = vadd.f32 %v550_v61, %v549_v59  ;;  %v542_v1 = vadd.f32 %v541_v62, %v540_v60 }
 0x19f   : > { %767 = vpush %v542_v1  ;;  %v552_v2 = vrot.slane %v551_v63, 1 }
 0x1a1   : > { %v553_v3 = vadd.f32 %v552_v2, %v551_v63 }
 0x1a3   : > { %769 = vpush %v553_v3 }
 0x1d0   : > { %s768_s7 = spop %767 }
 0x1d1   : > { %v562_v6 = vstv %s768_s7 }
 0x1d4   : > { %s770_s8 = spop %769 }
 0x1d5   : > { %s555_s9 = smul.f32 4.0, %s770_s8 }
 0x1d7   : > { %v560_v5 = vstv %s555_s9 }
 0x1d8   : > { %v561_v7 = vsel %vm559_vm2, %v560_v5, 0.0 }
 0x1d9   : > { %v563_v8 = vsel %vm558_vm3, %v562_v6, %v561_v7 }
 0x1da   : > { %564 = vst [vmem:[%s266_s12] sm:$0x1] %v563_v8 }
 0x1db PF: > { %s14_s17 = sadd.s32 1, %s820_s17   ;;  %s1009_s15 = smov %s816_s16 }
 0x1dc   : > { %p11_p5 = scmp.ge.s32.totalorder %s14_s17, 4   ;;  %s1010_s16 = smov %s1012_s18 }
 0x1de   :  { %13 = sbr.rel (!%p11_p5) target bundleno = 2 (0x2), region = 83 }

</bundles_post_ra>
